<compile_context>
chip_gen: v7x
topology: tpu7x:2x2x1
jax: 0.10.0
libtpu: 0.0.40
codegen_flags: <defaults>
</compile_context>

<pallas_src>
import math
import functools

import jax
import jax.numpy as jnp
from jax import lax
from jax.experimental import pallas as pl
from jax.experimental.pallas import tpu as pltpu


_LANE = 1024            # lane-dense last dim of the 2-D slab (multiple of 128)
_MAX_BLOCK_ROWS = 512   # 512 * 1024 * 4B = 2 MiB per f32 block


def _mix32(v):
    """lowbias32-style avalanche mixer on uint32 (pure VPU integer ops)."""
    v = v ^ (v >> 16)
    v = v * jnp.uint32(0x7FEB352D)
    v = v ^ (v >> 15)
    v = v * jnp.uint32(0x846CA68B)
    v = v ^ (v >> 16)
    return v


def _gaussian_noise_kernel(seed_ref, x_ref, o_ref, *, std, block_rows, block_cols):
    half = block_cols // 2

    # Counter-based PRNG: one unique counter per (grid step, row, lane-pair).
    pid = pl.program_id(0)
    base = pid * (block_rows * half)
    r_idx = lax.broadcasted_iota(jnp.int32, (block_rows, half), 0)
    c_idx = lax.broadcasted_iota(jnp.int32, (block_rows, half), 1)
    pair = (base + r_idx * half + c_idx).astype(jnp.uint32)

    key = seed_ref[0].astype(jnp.uint32) * jnp.uint32(0x9E3779B9)
    s1 = _mix32(pair ^ (key + jnp.uint32(0x85EBCA6B)))
    s2 = _mix32(pair ^ (key + jnp.uint32(0xC2B2AE35)))

    # uint32 -> uniform f32 in [0, 1) from the top 24 bits (exact in f32).
    inv24 = jnp.float32(1.0 / (1 << 24))
    u1 = (s1 >> 8).astype(jnp.int32).astype(jnp.float32) * inv24
    u2 = (s2 >> 8).astype(jnp.int32).astype(jnp.float32) * inv24

    # Box-Muller with BOTH branches: one (u1, u2) pair -> two normals.
    # Clamp away from 0 so log() is finite (truncates tail at ~5.7 sigma,
    # negligible for augmentation noise).
    u1 = jnp.maximum(u1, jnp.float32(1e-7))
    r = jnp.sqrt(jnp.float32(-2.0) * jnp.log(u1))
    theta = jnp.float32(2.0 * math.pi) * u2
    z = jnp.concatenate([r * jnp.cos(theta), r * jnp.sin(theta)], axis=-1)

    x = x_ref[...].astype(jnp.float32)
    o_ref[...] = (x + z * jnp.float32(std)).astype(o_ref.dtype)


def gaussian_noise(x, seed, std=0.05):
    """tensor + N(0, std^2) noise; same shape/dtype as x (PyTorch GaussianNoise)."""
    orig_shape = x.shape
    orig_dtype = x.dtype
    total = math.prod(orig_shape)

    # Lane-dense 2-D slab (rows, 1024).  For typical NCHW image batches
    # total % 1024 == 0 and the reshape is free (no extra HBM pass).
    padded = pl.cdiv(total, _LANE) * _LANE
    flat = x.reshape(-1)
    if padded != total:
        # TODO(synk): handle the ragged tail with a masked partial last block
        # instead of a pad+slice pass for the non-divisible case.
        flat = jnp.pad(flat, (0, padded - total))
    rows = padded // _LANE
    x2d = flat.reshape(rows, _LANE)

    block_rows = rows if rows <= _MAX_BLOCK_ROWS else _MAX_BLOCK_ROWS
    grid = (pl.cdiv(rows, block_rows),)

    seed_arr = jnp.asarray([seed], dtype=jnp.int32)

    kernel = functools.partial(
        _gaussian_noise_kernel,
        std=float(std),
        block_rows=block_rows,
        block_cols=_LANE,
    )

    itemsize = jnp.dtype(orig_dtype).itemsize
    cost = pl.CostEstimate(
        flops=12 * total,                      # hash + Box-Muller arithmetic
        transcendentals=2 * total,             # log/sqrt/cos/sin per pair
        bytes_accessed=2 * total * itemsize,   # read x + write out
    )

    out2d = pl.pallas_call(
        kernel,
        out_shape=jax.ShapeDtypeStruct(x2d.shape, orig_dtype),
        grid=grid,
        in_specs=[
            pl.BlockSpec(memory_space=pltpu.MemorySpace.SMEM),    # seed scalar
            pl.BlockSpec((block_rows, _LANE), lambda i: (i, 0)),  # data block
        ],
        out_specs=pl.BlockSpec((block_rows, _LANE), lambda i: (i, 0)),
        compiler_params=pltpu.CompilerParams(
            dimension_semantics=("parallel",),
        ),
        cost_estimate=cost,
    )(seed_arr, x2d)

    out = out2d.reshape(-1)
    if padded != total:
        out = out[:total]
    return out.reshape(orig_shape).astype(orig_dtype)


if __name__ == "__main__":
    key = jax.random.PRNGKey(0)
    # Small NCHW input consistent with an image-augmentation module.
    x = jax.random.normal(key, (2, 4, 16, 16), dtype=jnp.float32)

    y = gaussian_noise(x, seed=0, std=0.05)
    y = jax.block_until_ready(y)

    # Sanity checks: shape preserved, noise is small and roughly zero-mean.
    assert y.shape == x.shape
    diff = y - x
    assert float(jnp.max(jnp.abs(diff))) < 0.05 * 6.0   # ~6 sigma bound
    assert abs(float(jnp.mean(diff))) < 0.05            # loose mean check

    print("KERNEL_OK")
</pallas_src>

<mosaic_0001>
module attributes {stable_mosaic.version = 11 : i64} {
  func.func @_gaussian_noise_kernel(%arg0: i32, %arg1: memref<1xi32, #tpu.memory_space<smem>>, %arg2: memref<2x1024xf32, #tpu.memory_space<vmem>>, %arg3: memref<2x1024xf32, #tpu.memory_space<vmem>>) attributes {dimension_semantics = [#tpu.dimension_semantics<parallel>], iteration_bounds = array<i64: 1>, scalar_prefetch = 0 : i64, scratch_operands = 0 : i64, tpu.core_type = #tpu.core_type<tc>, window_params = [{transform_indices = @transform_0, window_bounds = array<i64: 1>}, {transform_indices = @transform_1, window_bounds = array<i64: 2, 1024>}, {transform_indices = @transform_2, window_bounds = array<i64: 2, 1024>}]} {
    %c1024_i32 = arith.constant 1024 : i32
    %0 = arith.muli %arg0, %c1024_i32 : i32
    %1 = tpu.iota {dimensions = array<i32: 0>} : vector<2x512xi32>
    %2 = tpu.iota {dimensions = array<i32: 1>} : vector<2x512xi32>
    %c512_i32 = arith.constant 512 : i32
    %3 = vector.broadcast %c512_i32 : i32 to vector<2x512xi32>
    %4 = arith.muli %1, %3 : vector<2x512xi32>
    %5 = vector.broadcast %0 : i32 to vector<2x512xi32>
    %6 = arith.addi %5, %4 : vector<2x512xi32>
    %7 = arith.addi %6, %2 : vector<2x512xi32>
    %c0 = arith.constant 0 : index
    %8 = memref.load %arg1[%c0] : memref<1xi32, #tpu.memory_space<smem>>
    %c-1640531527_i32 = arith.constant -1640531527 : i32
    %9 = arith.muli %8, %c-1640531527_i32 : i32
    %c-2048144789_i32 = arith.constant -2048144789 : i32
    %10 = arith.addi %9, %c-2048144789_i32 : i32
    %11 = vector.broadcast %10 : i32 to vector<2x512xi32>
    %12 = arith.xori %7, %11 : vector<2x512xi32>
    %c16_i32 = arith.constant 16 : i32
    %13 = vector.broadcast %c16_i32 : i32 to vector<2x512xi32>
    %14 = arith.shrui %12, %13 : vector<2x512xi32>
    %15 = arith.xori %12, %14 : vector<2x512xi32>
    %c2146121005_i32 = arith.constant 2146121005 : i32
    %16 = vector.broadcast %c2146121005_i32 : i32 to vector<2x512xi32>
    %17 = arith.muli %15, %16 : vector<2x512xi32>
    %c15_i32 = arith.constant 15 : i32
    %18 = vector.broadcast %c15_i32 : i32 to vector<2x512xi32>
    %19 = arith.shrui %17, %18 : vector<2x512xi32>
    %20 = arith.xori %17, %19 : vector<2x512xi32>
    %c-2073254261_i32 = arith.constant -2073254261 : i32
    %21 = vector.broadcast %c-2073254261_i32 : i32 to vector<2x512xi32>
    %22 = arith.muli %20, %21 : vector<2x512xi32>
    %c16_i32_0 = arith.constant 16 : i32
    %23 = vector.broadcast %c16_i32_0 : i32 to vector<2x512xi32>
    %24 = arith.shrui %22, %23 : vector<2x512xi32>
    %25 = arith.xori %22, %24 : vector<2x512xi32>
    %c-1028477387_i32 = arith.constant -1028477387 : i32
    %26 = arith.addi %9, %c-1028477387_i32 : i32
    %27 = vector.broadcast %26 : i32 to vector<2x512xi32>
    %28 = arith.xori %7, %27 : vector<2x512xi32>
    %c16_i32_1 = arith.constant 16 : i32
    %29 = vector.broadcast %c16_i32_1 : i32 to vector<2x512xi32>
    %30 = arith.shrui %28, %29 : vector<2x512xi32>
    %31 = arith.xori %28, %30 : vector<2x512xi32>
    %c2146121005_i32_2 = arith.constant 2146121005 : i32
    %32 = vector.broadcast %c2146121005_i32_2 : i32 to vector<2x512xi32>
    %33 = arith.muli %31, %32 : vector<2x512xi32>
    %c15_i32_3 = arith.constant 15 : i32
    %34 = vector.broadcast %c15_i32_3 : i32 to vector<2x512xi32>
    %35 = arith.shrui %33, %34 : vector<2x512xi32>
    %36 = arith.xori %33, %35 : vector<2x512xi32>
    %c-2073254261_i32_4 = arith.constant -2073254261 : i32
    %37 = vector.broadcast %c-2073254261_i32_4 : i32 to vector<2x512xi32>
    %38 = arith.muli %36, %37 : vector<2x512xi32>
    %c16_i32_5 = arith.constant 16 : i32
    %39 = vector.broadcast %c16_i32_5 : i32 to vector<2x512xi32>
    %40 = arith.shrui %38, %39 : vector<2x512xi32>
    %41 = arith.xori %38, %40 : vector<2x512xi32>
    %c8_i32 = arith.constant 8 : i32
    %42 = vector.broadcast %c8_i32 : i32 to vector<2x512xi32>
    %43 = arith.shrui %25, %42 : vector<2x512xi32>
    %44 = arith.sitofp %43 : vector<2x512xi32> to vector<2x512xf32>
    %cst = arith.constant 5.96046448E-8 : f32
    %45 = vector.broadcast %cst : f32 to vector<2x512xf32>
    %46 = arith.mulf %44, %45 : vector<2x512xf32>
    %c8_i32_6 = arith.constant 8 : i32
    %47 = vector.broadcast %c8_i32_6 : i32 to vector<2x512xi32>
    %48 = arith.shrui %41, %47 : vector<2x512xi32>
    %49 = arith.sitofp %48 : vector<2x512xi32> to vector<2x512xf32>
    %cst_7 = arith.constant 5.96046448E-8 : f32
    %50 = vector.broadcast %cst_7 : f32 to vector<2x512xf32>
    %51 = arith.mulf %49, %50 : vector<2x512xf32>
    %cst_8 = arith.constant 1.000000e-07 : f32
    %52 = vector.broadcast %cst_8 : f32 to vector<2x512xf32>
    %53 = arith.maximumf %46, %52 : vector<2x512xf32>
    %54 = math.log %53 : vector<2x512xf32>
    %cst_9 = arith.constant -2.000000e+00 : f32
    %55 = vector.broadcast %cst_9 : f32 to vector<2x512xf32>
    %56 = arith.mulf %55, %54 : vector<2x512xf32>
    %57 = math.sqrt %56 : vector<2x512xf32>
    %cst_10 = arith.constant 6.28318548 : f32
    %58 = vector.broadcast %cst_10 : f32 to vector<2x512xf32>
    %59 = arith.mulf %58, %51 : vector<2x512xf32>
    %60 = math.cos %59 : vector<2x512xf32>
    %61 = arith.mulf %57, %60 : vector<2x512xf32>
    %62 = math.sin %59 : vector<2x512xf32>
    %63 = arith.mulf %57, %62 : vector<2x512xf32>
    %64 = tpu.concatenate %61, %63 in 1 : vector<2x512xf32>, vector<2x512xf32> -> vector<2x1024xf32>
    %c0_11 = arith.constant 0 : index
    %c0_12 = arith.constant 0 : index
    %65 = vector.load %arg2[%c0_11, %c0_12] : memref<2x1024xf32, #tpu.memory_space<vmem>>, vector<2x1024xf32>
    %cst_13 = arith.constant 5.000000e-02 : f32
    %66 = vector.broadcast %cst_13 : f32 to vector<2x1024xf32>
    %67 = arith.mulf %64, %66 : vector<2x1024xf32>
    %68 = arith.addf %65, %67 : vector<2x1024xf32>
    %c0_14 = arith.constant 0 : index
    %c0_15 = arith.constant 0 : index
    %69 = vector.load %arg3[%c0_14, %c0_15] : memref<2x1024xf32, #tpu.memory_space<vmem>>, vector<2x1024xf32>
    tpu.vector_store %arg3[%c0_14, %c0_15], %68 {strides = array<i32>} : memref<2x1024xf32, #tpu.memory_space<vmem>>, vector<2x1024xf32>,
    return
  }
  func.func @transform_0(%arg0: i32) -> i32 {
    %c0_i32 = arith.constant 0 : i32
    %c0_i32_0 = arith.constant 0 : i32
    return %c0_i32 : i32
  }
  func.func @transform_1(%arg0: i32) -> (i32, i32) {
    %c0_i32 = arith.constant 0 : i32
    %c0_i32_0 = arith.constant 0 : i32
    return %arg0, %c0_i32 : i32, i32
  }
  func.func @transform_2(%arg0: i32) -> (i32, i32) {
    %c0_i32 = arith.constant 0 : i32
    %c0_i32_0 = arith.constant 0 : i32
    return %arg0, %c0_i32 : i32, i32
  }
}

</mosaic_0001>

<bundles_post_ra>
// kernel: tpu_custom_call.1
= control target key start
LH: loop header
LB: loop body
LE: loop exit
PB: predicated region body
PF: predicated region fallthrough
CT: control target
= control target key end

     0   :  { %8 = vsyncpa [#allocation4], 0  ;;  %s1718_s0 = inlined_call_operand.<no memory space> [shape: s32[1], index: 0, kind: input, shape index: {}]   ;;  %s1719_s1 = inlined_call_operand.hbm [shape: f32[2,1024], index: 1, kind: input, shape index: {}]   ;;  %s1720_s2 = inlined_call_operand.hbm [shape: f32[2,1024], index: 2, kind: output, shape index: {}]  }
   0x1   :  { %9 = vsyncpa [#allocation5], 0  ;;  %s1236_s9 = smov [#allocation3]   ;;  %s1188_s13 = scalar_lea.hbm %s1719_s1, 256 }
   0x2   :  { %s18_s10 = sshll.u32 %s1236_s9, 4  ;;  %p1189_p0 = scmp.ne.s32.totalorder %s1719_s1, %s1188_s13  ;;  %s19_s10 = int_to_ptr.vmem [resolvable:$true] %s18_s10 }
   0x3   :  { %p1192_p1 = scmp.lt.u32.totalorder %s1188_s13, %s1719_s1 }
   0x5   :  { %p1194_p2 = pnand %p1192_p1, %p1189_p0 }
   0x7   :  { %1197 = shalt.err (!%p1194_p2)
}
   0x8   :  { %s1198_s18 = scalar_lea.vmem %s19_s10, 256  ;;  %p1203_p4 = scmp.lt.s32.totalorder %s19_s10, %s19_s10 }
   0x9   :  { %p1199_p3 = scmp.ne.s32.totalorder %s19_s10, %s1198_s18  ;;  %p1204_p5 = scmp.lt.s32.totalorder %s1198_s18, %s1198_s18 }
   0xb   :  { %p1205_p6 = por %p1204_p5, %p1203_p4 }
   0xd   :  { %p1206_p7 = pnand %p1205_p6, %p1199_p3 }
   0xf   :  { %1209 = shalt.err (!%p1206_p7)
}
  0x10   :  { %21 = dma.hbm_to_vmem [thread:$0]  %s1719_s1, 256, %s19_s10, [#allocation4]  }
  0x11   :  { %1232 = dma.done.wait [#allocation4], 256  }
  0x12   :  { %1233 = vsyncadd [#allocation4], 4294967040  ;;  %v26_v0 = vlaneseq  ;;  %s41_s23 = smul.u32 2654435769, %s1718_s0  ;;  %s1244_s1 = smov [#allocation6]  }
  0x13   :  { %s1090_s25 = sshll.u32 %s1244_s1, 4  ;;  %s1091_s25 = int_to_ptr.vmem [resolvable:$true] %s1090_s25 }
  0x14   :  { %v1275_v1 = vshrl.u32 %v26_v0, 7  ;;  %v29_v2 = vand.u32 127, %v26_v0  ;;  %s80_s24 = sadd.s32 3266489909, %s41_s23  ;;  %s42_s0 = sadd.s32 2246822507, %s41_s23 }
  0x15   :  { %v81_v9 = vstv %s80_s24  ;;  %v43_v21 = vstv %s42_s0  ;;  %s1210_s26 = scalar_lea.vmem %s1091_s25, 256  ;;  %p1215_p9 = scmp.lt.s32.totalorder %s1091_s25, %s1091_s25 }
  0x16   :  { %v30_v3 = vadd.s32 128, %v29_v2  ;;  %v31_v4 = vadd.s32 256, %v29_v2  ;;  %v33_v5 = vmul.u32 512, %v1275_v1  ;;  %v32_v10 = vadd.s32 384, %v29_v2  ;;  %p1211_p8 = scmp.ne.s32.totalorder %s1091_s25, %s1210_s26  ;;  %p1216_p10 = scmp.lt.s32.totalorder %s1210_s26, %s1210_s26 }
  0x18   :  { %v36_v6 = vadd.s32 %v33_v5, %v29_v2  ;;  %v37_v7 = vadd.s32 %v33_v5, %v30_v3  ;;  %v38_v8 = vadd.s32 %v33_v5, %v31_v4  ;;  %v39_v17 = vadd.s32 %v33_v5, %v32_v10  ;;  %p1217_p11 = por %p1216_p10, %p1215_p9 }
  0x1a   :  { %v82_v11 = vxor.u32 %v81_v9, %v36_v6  ;;  %v83_v12 = vxor.u32 %v81_v9, %v37_v7  ;;  %v84_v13 = vxor.u32 %v81_v9, %v38_v8  ;;  %v85_v22 = vxor.u32 %v81_v9, %v39_v17  ;;  %p1218_p12 = pnand %p1217_p11, %p1211_p8 }
  0x1b   :  { %v44_v28 = vxor.u32 %v43_v21, %v36_v6  ;;  %v45_v43 = vxor.u32 %v43_v21, %v37_v7  ;;  %v46_v49 = vxor.u32 %v43_v21, %v38_v8  ;;  %v47_v52 = vxor.u32 %v43_v21, %v39_v17 }
  0x1c   :  { %v86_v14 = vshrl.u32 %v82_v11, 16  ;;  %v87_v15 = vshrl.u32 %v83_v12, 16  ;;  %v88_v16 = vshrl.u32 %v84_v13, 16  ;;  %v89_v30 = vshrl.u32 %v85_v22, 16 }
  0x1d   :  { %v48_v36 = vshrl.u32 %v44_v28, 16  ;;  %v49_v53 = vshrl.u32 %v45_v43, 16  ;;  %v50_v59 = vshrl.u32 %v46_v49, 16  ;;  %v51_v62 = vshrl.u32 %v47_v52, 16 }
  0x1e   :  { %v90_v18 = vxor.u32 %v86_v14, %v82_v11  ;;  %v91_v19 = vxor.u32 %v87_v15, %v83_v12  ;;  %v92_v20 = vxor.u32 %v88_v16, %v84_v13  ;;  %v93_v37 = vxor.u32 %v89_v30, %v85_v22 }
  0x1f   :  { %v52_v44 = vxor.u32 %v48_v36, %v44_v28  ;;  %v53_v63 = vxor.u32 %v49_v53, %v45_v43  ;;  %v54_v5 = vxor.u32 %v50_v59, %v46_v49  ;;  %v55_v8 = vxor.u32 %v51_v62, %v47_v52 }
  0x20   :  { %v94_v23 = vmul.u32 2146121005, %v90_v18  ;;  %v95_v24 = vmul.u32 2146121005, %v91_v19 }
  0x21   :  { %v96_v25 = vmul.u32 2146121005, %v92_v20  ;;  %v97_v45 = vmul.u32 2146121005, %v93_v37 }
  0x22   :  { %v98_v26 = vshrl.u32 %v94_v23, 15  ;;  %v99_v27 = vshrl.u32 %v95_v24, 15  ;;  %v56_v54 = vmul.u32 2146121005, %v52_v44  ;;  %v57_v9 = vmul.u32 2146121005, %v53_v63 }
  0x23   :  { %v100_v29 = vshrl.u32 %v96_v25, 15  ;;  %v101_v55 = vshrl.u32 %v97_v45, 15  ;;  %v58_v15 = vmul.u32 2146121005, %v54_v5  ;;  %v59_v17 = vmul.u32 2146121005, %v55_v8 }
  0x24   :  { %v102_v31 = vxor.u32 %v98_v26, %v94_v23  ;;  %v103_v32 = vxor.u32 %v99_v27, %v95_v24  ;;  %v60_v0 = vshrl.u32 %v56_v54, 15  ;;  %v61_v18 = vshrl.u32 %v57_v9, 15 }
  0x25   :  { %v104_v33 = vxor.u32 %v100_v29, %v96_v25  ;;  %v105_v2 = vxor.u32 %v101_v55, %v97_v45  ;;  %v62_v25 = vshrl.u32 %v58_v15, 15  ;;  %v63_v27 = vshrl.u32 %v59_v17, 15 }
  0x26   :  { %v106_v34 = vmul.u32 2221713035, %v102_v31  ;;  %v107_v35 = vmul.u32 2221713035, %v103_v32  ;;  %v64_v10 = vxor.u32 %v60_v0, %v56_v54  ;;  %v1285_v28 = vxor.u32 %v61_v18, %v57_v9 }
  0x27   :  { %v108_v40 = vmul.u32 2221713035, %v104_v33  ;;  %v109_v11 = vmul.u32 2221713035, %v105_v2  ;;  %v1294_v36 = vxor.u32 %v62_v25, %v58_v15  ;;  %v1296_v37 = vxor.u32 %v63_v27, %v59_v17 }
  0x28   :  { %v110_v38 = vshrl.u32 %v106_v34, 16  ;;  %v111_v39 = vshrl.u32 %v107_v35, 16  ;;  %v68_v19 = vmul.u32 2221713035, %v64_v10  ;;  %v1240_v54 = vmov 2102212464  }
  0x29   :  { %v112_v48 = vshrl.u32 %v108_v40, 16  ;;  %v113_v20 = vshrl.u32 %v109_v11, 16  ;;  %v1242_v2 = vmov 1326507024   ;;  %v70_v25 = vmul.u32 2221713035, %v1294_v36 }
  0x2a   :  { %v114_v41 = vxor.u32 %v110_v38, %v106_v34  ;;  %v115_v42 = vxor.u32 %v111_v39, %v107_v35  ;;  %v72_v29 = vshrl.u32 %v68_v19, 16  ;;  %v69_v38 = vmul.u32 2221713035, %v1285_v28 }
  0x2b   :  { %v116_v58 = vxor.u32 %v112_v48, %v108_v40  ;;  %v1287_v30 = vxor.u32 %v113_v20, %v109_v11  ;;  %v1237_v40 = vmov 683565275  }
  0x2c   :  { %v130_v46 = vshrl.u32 %v114_v41, 8  ;;  %v131_v47 = vshrl.u32 %v115_v42, 8  ;;  %v1299_v39 = vxor.u32 %v72_v29, %v68_v19  ;;  %v73_v27 = vshrl.u32 %v69_v38, 16 }
  0x2d   :  { %v132_v4 = vshrl.u32 %v116_v58, 8  ;;  %v133_v42 = vshrl.u32 %v1287_v30, 8  ;;  %v1241_v58 = vmov 920167782  }
  0x2e   :  { %v134_v50 = vcvt.s32.f32 %v130_v46  ;;  %v135_v51 = vcvt.s32.f32 %v131_v47  ;;  %v1238_v47 = vmov 2475754826   ;;  %v118_v30 = vshrl.u32 %v1299_v39, 8 }
  0x2f   :  { %v136_v13 = vcvt.s32.f32 %v132_v4 }
  0x30   :  { %v138_v56 = vmul.f32 5.9604645e-08, %v134_v50  ;;  %v139_v57 = vmul.f32 5.9604645e-08, %v135_v51  ;;  %v1239_v51 = vmov 2131351028  }
  0x31   :  { %v140_v22 = vmul.f32 5.9604645e-08, %v136_v13 }
  0x32   :  { %v1278_v60 = vmul.f32 6.2831855, %v138_v56  ;;  %v1280_v61 = vmul.f32 6.2831855, %v139_v57 }
  0x33   :  { %v1292_v33 = vmul.f32 6.2831855, %v140_v22 }
  0x34   :  { %v193_v3 = vand.u32 2139095040, %v1278_v60  ;;  %v296_v7 = vand.u32 2139095040, %v1280_v61  ;;  %v190_v21 = vand.u32 2147483647, %v1278_v60  ;;  %v293_v32 = vand.u32 2147483647, %v1280_v61 }
  0x35   :  { %v399_v49 = vand.u32 2139095040, %v1292_v33 }
  0x36   :  { %v194_v6 = vshrl.u32 %v193_v3, 23  ;;  %v297_v14 = vshrl.u32 %v296_v7, 23  ;;  %v197_v31 = vand.u32 8388607, %v190_v21  ;;  %v300_v45 = vand.u32 8388607, %v293_v32 }
  0x37   :  { %v400_v5 = vshrl.u32 %v399_v49, 23 }
  0x38   :  { %v1099_v12 = vadd.s32 4294967169, %v194_v6  ;;  %v1103_v24 = vadd.s32 4294967169, %v297_v14  ;;  %v198_v43 = vor.u32 8388608, %v197_v31  ;;  %v301_v18 = vor.u32 8388608, %v300_v45 }
  0x39   :  { %v1107_v19 = vadd.s32 4294967169, %v400_v5  ;;  %v137_v31 = vcvt.s32.f32 %v133_v42 }
  0x3a   :  { %v200_v16 = vadd.s32 1, %v1099_v12  ;;  %v303_v35 = vadd.s32 1, %v1103_v24  ;;  %v238_v8 = vshll.u32 %v198_v43, 8  ;;  %v1332_v45 = vshll.u32 %v301_v18, 8 }
  0x3c   :  { %vm201_vm0 = vcmp.gt.s32.totalorder %v200_v16, 0  ;;  %vm304_vm1 = vcmp.gt.s32.totalorder %v303_v35, 0 }
  0x3d   :  { %v202_v23 = vsel %vm201_vm0, %v200_v16, 0  ;;  %v305_v9 = vsel %vm304_vm1, %v303_v35, 0 }
  0x3e   :  { %v204_v26 = vand.u32 31, %v202_v23  ;;  %v203_v44 = vshrl.u32 %v202_v23, 5  ;;  %v306_v23 = vshrl.u32 %v305_v9, 5  ;;  %v307_v24 = vand.u32 31, %v305_v9 }
  0x40   :  { %v205_v34 = vsub.s32 32, %v204_v26  ;;  %v207_v41 = vshll.u32 %v1237_v40, %v204_v26  ;;  %v210_v50 = vshll.u32 %v1238_v47, %v204_v26  ;;  %v213_v53 = vshll.u32 %v1239_v51, %v204_v26 }
  0x41   :  { %v216_v57 = vshll.u32 %v1240_v54, %v204_v26  ;;  %v219_v62 = vshll.u32 %v1241_v58, %v204_v26  ;;  %vm222_vm2 = vcmp.lt.s32.totalorder %v203_v44, 1  ;;  %vm224_vm3 = vcmp.lt.s32.totalorder %v203_v44, 3 }
  0x42   :  { %v206_v46 = vshrl.u32 %v1237_v40, %v205_v34  ;;  %v208_v48 = vshrl.u32 %v1238_v47, %v205_v34  ;;  %v211_v52 = vshrl.u32 %v1239_v51, %v205_v34  ;;  %v214_v55 = vshrl.u32 %v1240_v54, %v205_v34 }
  0x43   :  { %v217_v59 = vshrl.u32 %v1241_v58, %v205_v34  ;;  %v220_v3 = vshrl.u32 %v1242_v2, %v205_v34  ;;  %vm225_vm4 = vcmp.lt.s32.totalorder %v203_v44, 4  ;;  %vm223_vm5 = vcmp.lt.s32.totalorder %v203_v44, 2 }
  0x44   :  { %v209_v56 = vor.u32 %v208_v48, %v207_v41  ;;  %v212_v63 = vor.u32 %v211_v52, %v210_v50  ;;  %v215_v0 = vor.u32 %v214_v55, %v213_v53  ;;  %v71_v26 = vmul.u32 2221713035, %v1296_v37 }
  0x45   :  { %v218_v4 = vor.u32 %v217_v59, %v216_v57  ;;  %v221_v6 = vor.u32 %v220_v3, %v219_v62  ;;  %v308_v49 = vsub.s32 32, %v307_v24  ;;  %v310_v50 = vshll.u32 %v1237_v40, %v307_v24 }
  0x46   :  { %v227_v7 = vsel %vm225_vm4, %v215_v0, 2102212464  ;;  %v230_v10 = vsel %vm222_vm2, %v209_v56, %v212_v63  ;;  %v234_v12 = vsel %vm222_vm2, %v212_v63, %v215_v0  ;;  %v226_v13 = vsel %vm222_vm2, %v206_v46, %v209_v56 }
  0x47   :  { %v231_v11 = vsel %vm225_vm4, %v218_v4, 920167782  ;;  %v228_v14 = vsel %vm224_vm3, %v212_v63, %v227_v7  ;;  %v235_v16 = vsel %vm225_vm4, %v221_v6, 1326507024  ;;  %v406_v46 = vadd.s32 1, %v1107_v19 }
  0x48   :  { %v232_v15 = vsel %vm224_vm3, %v215_v0, %v231_v11  ;;  %v236_v17 = vsel %vm224_vm3, %v218_v4, %v235_v16  ;;  %v229_v29 = vsel %vm223_vm5, %v226_v13, %v228_v14  ;;  %vm325_vm6 = vcmp.lt.s32.totalorder %v306_v23, 1 }
  0x49   :  { %v233_v20 = vsel %vm223_vm5, %v230_v10, %v232_v15  ;;  %v237_v22 = vsel %vm223_vm5, %v234_v12, %v236_v17  ;;  %v245_v48 = vmul.u32 %v238_v8, %v229_v29  ;;  %v313_v44 = vshll.u32 %v1238_v47, %v307_v24 }
  0x4a   :  { %v1325_v34 = vmul.u32.u64.low %v238_v8, %v237_v22  ;;  %v1326_v35 = vmul.u32.u64.high %v238_v8, %v237_v22, %v1325_v34  ;;  %v1328_v41 = vmul.u32.u64.low %v238_v8, %v233_v20  ;;  %v1329_v43 = vmul.u32.u64.high %v238_v8, %v233_v20, %v1328_v41 }
  0x4b   :  { %v316_v39 = vshll.u32 %v1239_v51, %v307_v24  ;;  %v319_v42 = vshll.u32 %v1240_v54, %v307_v24  ;;  %v322_v52 = vshll.u32 %v1241_v58, %v307_v24  ;;  %v309_v53 = vshrl.u32 %v1237_v40, %v308_v49 }
  0x4c   :  { %vm247_vm7 = vc.u32 %v1326_v35, %v1328_v41  ;;  %v311_v55 = vshrl.u32 %v1238_v47, %v308_v49  ;;  %vm326_vm8 = vcmp.lt.s32.totalorder %v306_v23, 2  ;;  %v248_v56 = vadd.s32 1, %v1329_v43 }
  0x4d   :  { %v314_v57 = vshrl.u32 %v1239_v51, %v308_v49  ;;  %v317_v59 = vshrl.u32 %v1240_v54, %v308_v49  ;;  %v320_v62 = vshrl.u32 %v1241_v58, %v308_v49  ;;  %v323_v0 = vshrl.u32 %v1242_v2, %v308_v49 }
  0x4e   :  { %v312_v63 = vor.u32 %v311_v55, %v310_v50  ;;  %vm327_vm9 = vcmp.lt.s32.totalorder %v306_v23, 3  ;;  %vm328_vm10 = vcmp.lt.s32.totalorder %v306_v23, 4  ;;  %v249_v3 = vsel %vm247_vm7, %v248_v56, %v1329_v43 }
  0x4f   :  { %v315_v4 = vor.u32 %v314_v57, %v313_v44  ;;  %v318_v5 = vor.u32 %v317_v59, %v316_v39  ;;  %v321_v6 = vor.u32 %v320_v62, %v319_v42  ;;  %v250_v7 = vadd.s32 %v249_v3, %v245_v48 }
  0x50   :  { %v324_v8 = vor.u32 %v323_v0, %v322_v52  ;;  %v329_v9 = vsel %vm325_vm6, %v309_v53, %v312_v63  ;;  %vm407_vm11 = vcmp.gt.s32.totalorder %v406_v46, 0  ;;  %v396_v50 = vand.u32 2147483647, %v1292_v33 }
  0x51   :  { %v330_v10 = vsel %vm328_vm10, %v318_v5, 2102212464  ;;  %v333_v11 = vsel %vm325_vm6, %v312_v63, %v315_v4  ;;  %v334_v12 = vsel %vm328_vm10, %v321_v6, 920167782  ;;  %v337_v13 = vsel %vm325_vm6, %v315_v4, %v318_v5 }
  0x52   :  { %v251_v14 = vadd.s32 536870912, %v250_v7  ;;  %v331_v15 = vsel %vm327_vm9, %v315_v4, %v330_v10  ;;  %v335_v16 = vsel %vm327_vm9, %v318_v5, %v334_v12  ;;  %v338_v17 = vsel %vm328_vm10, %v324_v8, 1326507024 }
  0x53   :  { %v332_v18 = vsel %vm326_vm8, %v329_v9, %v331_v15  ;;  %v336_v19 = vsel %vm326_vm8, %v333_v11, %v335_v16  ;;  %v339_v20 = vsel %vm327_vm9, %v321_v6, %v338_v17  ;;  %v408_v22 = vsel %vm407_vm11, %v406_v46, 0 }
  0x54   :  { %v1360_v24 = vshrl.u32 %v251_v14, 30  ;;  %v340_v29 = vsel %vm326_vm8, %v337_v13, %v339_v20  ;;  %v1364_v34 = vmul.u32.u64.low %v1332_v45, %v336_v19  ;;  %v1365_v43 = vmul.u32.u64.high %v1332_v45, %v336_v19, %v1364_v34 }
  0x55   :  { %v1369_v48 = vmul.u32.u64.low %v1332_v45, %v340_v29  ;;  %v1370_v49 = vmul.u32.u64.high %v1332_v45, %v340_v29, %v1369_v48  ;;  %v74_v44 = vshrl.u32 %v70_v25, 16  ;;  %v75_v46 = vshrl.u32 %v71_v26, 16 }
  0x56   :  { %v253_v23 = vshll.u32 %v1360_v24, 30  ;;  %v410_v39 = vand.u32 31, %v408_v22  ;;  %v77_v42 = vxor.u32 %v73_v27, %v69_v38  ;;  %v122_v52 = vcvt.s32.f32 %v118_v30 }
  0x57   :  { %v348_v53 = vmul.u32 %v1332_v45, %v332_v18  ;;  %v141_v55 = vmul.f32 5.9604645e-08, %v137_v31  ;;  %v351_v57 = vadd.s32 1, %v1365_v43  ;;  %vm350_vm12 = vc.u32 %v1370_v49, %v1364_v34 }
  0x58   :  { %v1381_v56 = vsub.s32 %v250_v7, %v253_v23  ;;  %v411_v59 = vsub.s32 32, %v410_v39  ;;  %v403_v62 = vand.u32 8388607, %v396_v50  ;;  %v1388_v63 = vshrl.u32 %v408_v22, 5 }
  0x59   :  { %v78_v28 = vxor.u32 %v74_v44, %v70_v25  ;;  %v79_v38 = vxor.u32 %v75_v46, %v71_v26  ;;  %v352_v27 = vsel %vm350_vm12, %v351_v57, %v1365_v43  ;;  %v413_v30 = vshll.u32 %v1237_v40, %v410_v39 }
  0x5a   :  { %v353_v31 = vadd.s32 %v352_v27, %v348_v53  ;;  %v414_v45 = vshrl.u32 %v1238_v47, %v411_v59  ;;  %v416_v0 = vshll.u32 %v1238_v47, %v410_v39  ;;  %v417_v3 = vshrl.u32 %v1239_v51, %v411_v59 }
  0x5b   :  { %v119_v4 = vshrl.u32 %v77_v42, 8  ;;  %v126_v5 = vmul.f32 5.9604645e-08, %v122_v52  ;;  %v1399_v6 = vmul.f32 6.2831855, %v141_v55  ;;  %v256_v36 = vsub.s32 0, %v1381_v56 }
  0x5c   :  { %v354_v25 = vadd.s32 536870912, %v353_v31  ;;  %v404_v37 = vor.u32 8388608, %v403_v62  ;;  %v419_v26 = vshll.u32 %v1239_v51, %v410_v39  ;;  %vm431_vm13 = vcmp.lt.s32.totalorder %v1388_v63, 4 }
  0x5d   :  { %v415_v7 = vor.u32 %v414_v45, %v413_v30  ;;  %v420_v8 = vshrl.u32 %v1240_v54, %v411_v59  ;;  %v422_v9 = vshll.u32 %v1240_v54, %v410_v39  ;;  %v423_v10 = vshrl.u32 %v1241_v58, %v411_v59 }
  0x5e   :  { %v1407_v11 = vshrl.u32 %v354_v25, 30  ;;  %v418_v12 = vor.u32 %v417_v3, %v416_v0  ;;  %v425_v13 = vshll.u32 %v1241_v58, %v410_v39  ;;  %v426_v14 = vshrl.u32 %v1242_v2, %v411_v59 }
  0x5f   :  { %v1100_v15 = vmin.u32 %v256_v36, %v1381_v56  ;;  %v421_v16 = vor.u32 %v420_v8, %v419_v26  ;;  %v424_v17 = vor.u32 %v423_v10, %v422_v9  ;;  %vm428_vm14 = vcmp.lt.s32.totalorder %v1388_v63, 1 }
  0x60   :  { %v120_v18 = vshrl.u32 %v78_v28, 8  ;;  %v121_v19 = vshrl.u32 %v79_v38, 8  ;;  %v356_v20 = vshll.u32 %v1407_v11, 30  ;;  %v412_v22 = vshrl.u32 %v1237_v40, %v411_v59 }
  0x61   :  { %v427_v29 = vor.u32 %v426_v14, %v425_v13  ;;  %vm430_vm15 = vcmp.lt.s32.totalorder %v1388_v63, 3  ;;  %v433_v43 = vsel %vm431_vm13, %v421_v16, 2102212464  ;;  %v437_v48 = vsel %vm431_vm13, %v424_v17, 920167782 }
  0x62   :  { %v1420_v44 = vsub.s32 %v353_v31, %v356_v20  ;;  %vm429_vm0 = vcmp.lt.s32.totalorder %v1388_v63, 2  ;;  %v436_v46 = vsel %vm428_vm14, %v415_v7, %v418_v12  ;;  %v502_v23 = vand.u32 2139095040, %v1399_v6 }
  0x63   :  { %v142_v39 = vmax.f32 %v126_v5, 1e-07  ;;  %v258_v42 = vclz %v1100_v15  ;;  %v444_v52 = vshll.u32 %v404_v37, 8  ;;  %v432_v55 = vsel %vm428_vm14, %v412_v22, %v415_v7 }
  0x64   :  { %v359_v53 = vsub.s32 0, %v1420_v44  ;;  %v434_v57 = vsel %vm430_vm15, %v418_v12, %v433_v43  ;;  %v438_v59 = vsel %vm430_vm15, %v421_v16, %v437_v48  ;;  %v123_v62 = vcvt.s32.f32 %v119_v4 }
  0x65   :  { %v439_v28 = vsel %vm429_vm0, %v436_v46, %v438_v59  ;;  %v440_v38 = vsel %vm428_vm14, %v418_v12, %v421_v16  ;;  %v441_v27 = vsel %vm431_vm13, %v427_v29, 1326507024  ;;  %v124_v30 = vcvt.s32.f32 %v120_v18 }
  0x66   :  { %v125_v31 = vcvt.s32.f32 %v121_v19  ;;  %v1104_v45 = vmin.u32 %v359_v53, %v1420_v44  ;;  %v503_v0 = vshrl.u32 %v502_v23, 23  ;;  %1156 = vlog2.f32 %v142_v39 }
  0x67   :  { %v1101_v3 = vadd.s32 4294967294, %v258_v42  ;;  %v435_v5 = vsel %vm429_vm0, %v432_v55, %v434_v57  ;;  %v442_v4 = vsel %vm430_vm15, %v424_v17, %v441_v27  ;;  %v127_v9 = vmul.f32 5.9604645e-08, %v123_v62 }
  0x68   :  { %v361_v36 = vclz %v1104_v45  ;;  %v443_v25 = vsel %vm429_vm0, %v440_v38, %v442_v4  ;;  %v1446_v37 = vmul.u32.u64.low %v444_v52, %v439_v28  ;;  %v1447_v26 = vmul.u32.u64.high %v444_v52, %v439_v28, %v1446_v37 }
  0x69   :  { %v1450_v7 = vmul.u32.u64.low %v444_v52, %v443_v25  ;;  %v1451_v8 = vmul.u32.u64.high %v444_v52, %v443_v25, %v1450_v7  ;;  %v1111_v10 = vadd.s32 4294967169, %v503_v0  ;;  %v128_v12 = vmul.f32 5.9604645e-08, %v124_v30 }
  0x6a   :  { %v129_v13 = vmul.f32 5.9604645e-08, %v125_v31  ;;  %v451_v14 = vmul.u32 %v444_v52, %v435_v5  ;;  %vm1102_vm1 = vcmp.lt.s32.totalorder %v1101_v3, 0  ;;  %v1105_v15 = vadd.s32 4294967294, %v361_v36 }
  0x6b   :  { %v454_v16 = vadd.s32 1, %v1447_v26  ;;  %v509_v17 = vadd.s32 1, %v1111_v10  ;;  %vm453_vm2 = vc.u32 %v1451_v8, %v1446_v37  ;;  %v143_v63 = vmax.f32 %v127_v9, 1e-07 }
  0x6c   :  { %v144_v19 = vmax.f32 %v128_v12, 1e-07  ;;  %v261_v20 = vsel %vm1102_vm1, 0, %v1101_v3  ;;  %v145_v29 = vmax.f32 %v129_v13, 1e-07  ;;  %vm1106_vm4 = vcmp.lt.s32.totalorder %v1105_v15, 0 }
  0x6d   :  { %v455_v18 = vsel %vm453_vm2, %v454_v16, %v1447_v26  ;;  %vm510_vm3 = vcmp.gt.s32.totalorder %v509_v17, 0  ;;  %1158 = vlog2.f32 %v143_v63  ;;  %v246_v39 = vadd.s32 %v1328_v41, %v1326_v35 }
  0x6e   :  { %v456_v22 = vadd.s32 %v455_v18, %v451_v14  ;;  %v511_v43 = vsel %vm510_vm3, %v509_v17, 0  ;;  %v262_v42 = vsub.s32 32, %v261_v20  ;;  %v266_v52 = vsub.s32 4294967266, %v261_v20 }
  0x6f   :  { %v513_v23 = vand.u32 31, %v511_v43  ;;  %1160 = vlog2.f32 %v144_v19  ;;  %v1459_v53 = vsel %vm1106_vm4, 0, %v1105_v15  ;;  %v499_v59 = vand.u32 2147483647, %v1399_v6 }
  0x70   :  { %v1157_v48 = vpop.eup %1156  ;;  %v457_v46 = vadd.s32 536870912, %v456_v22  ;;  %1162 = vlog2.f32 %v145_v29  ;;  %v263_v28 = vshll.u32 %v1381_v56, %v261_v20  ;;  %v349_v38 = vadd.s32 %v1364_v34, %v1370_v49 }
  0x71   :  { %v514_v57 = vsub.s32 32, %v513_v23  ;;  %v1464_v62 = vmul.f32 0.6931472, %v1157_v48  ;;  %v264_v41 = vshrl.u32 %v246_v39, %v262_v42  ;;  %v267_v27 = vadd.s32 127, %v266_v52 }
  0x72   :  { %v1461_v55 = vshrl.u32 %v457_v46, 30  ;;  %v369_v30 = vsub.s32 4294967266, %v1459_v53  ;;  %v516_v31 = vshll.u32 %v1237_v40, %v513_v23  ;;  %v519_v3 = vshll.u32 %v1238_v47, %v513_v23 }
  0x73   :  { %v517_v0 = vshrl.u32 %v1238_v47, %v514_v57  ;;  %v520_v5 = vshrl.u32 %v1239_v51, %v514_v57  ;;  %v506_v56 = vand.u32 8388607, %v499_v59  ;;  %v512_v34 = vshrl.u32 %v511_v43, 5 }
  0x74   :  { %v459_v35 = vshll.u32 %v1461_v55, 30  ;;  %v522_v49 = vshll.u32 %v1239_v51, %v513_v23  ;;  %v525_v4 = vshll.u32 %v1240_v54, %v513_v23  ;;  %v523_v25 = vshrl.u32 %v1240_v54, %v514_v57 }
  0x75   :  { %v526_v26 = vshrl.u32 %v1241_v58, %v514_v57  ;;  %v528_v7 = vshll.u32 %v1241_v58, %v513_v23  ;;  %v1485_v9 = vor.u32 %v264_v41, %v263_v28  ;;  %v365_v47 = vsub.s32 32, %v1459_v53 }
  0x76   :  { %v1472_v45 = vsub.s32 %v456_v22, %v459_v35  ;;  %v370_v10 = vadd.s32 127, %v369_v30  ;;  %v529_v12 = vshrl.u32 %v1242_v2, %v514_v57  ;;  %v268_v13 = vshll.u32 %v267_v27, 23 }
  0x77   :  { %v518_v14 = vor.u32 %v517_v0, %v516_v31  ;;  %v521_v15 = vor.u32 %v520_v5, %v519_v3  ;;  %v1159_v16 = vpop.eup %1158  ;;  %v507_v17 = vor.u32 8388608, %v506_v56  ;;  %v515_v54 = vshrl.u32 %v1237_v40, %v514_v57 }
  0x78   :  { %v462_v36 = vsub.s32 0, %v1472_v45  ;;  %v527_v63 = vor.u32 %v526_v26, %v525_v4  ;;  %vm531_vm5 = vcmp.lt.s32.totalorder %v512_v34, 1  ;;  %v524_v19 = vor.u32 %v523_v25, %v522_v49 }
  0x79   :  { %v1161_v18 = vpop.eup %1160  ;;  %v530_v20 = vor.u32 %v529_v12, %v528_v7  ;;  %vm534_vm6 = vcmp.lt.s32.totalorder %v512_v34, 4  ;;  %v366_v2 = vshll.u32 %v1420_v44, %v1459_v53  ;;  %v367_v29 = vshrl.u32 %v349_v38, %v365_v47 }
  0x7a   :  { %v1108_v51 = vmin.u32 %v462_v36, %v1472_v45  ;;  %v1163_v22 = vpop.eup %1162  ;;  %v371_v43 = vshll.u32 %v370_v10, 23  ;;  %vm533_vm7 = vcmp.lt.s32.totalorder %v512_v34, 3  ;;  %vm532_vm8 = vcmp.lt.s32.totalorder %v512_v34, 2 }
  0x7b   :  { %v536_v46 = vsel %vm534_vm6, %v524_v19, 2102212464  ;;  %v539_v40 = vsel %vm531_vm5, %v518_v14, %v521_v15  ;;  %v269_v23 = vor.u32 4788187, %v268_v13  ;;  %v535_v39 = vsel %vm531_vm5, %v515_v54, %v518_v14 }
  0x7c   :  { %v464_v58 = vclz %v1108_v51  ;;  %v540_v42 = vsel %vm534_vm6, %v527_v63, 920167782  ;;  %v547_v52 = vshll.u32 %v507_v17, 8  ;;  %v543_v44 = vsel %vm531_vm5, %v521_v15, %v524_v19 }
  0x7d   :  { %v541_v57 = vsel %vm533_vm7, %v524_v19, %v540_v42  ;;  %v544_v53 = vsel %vm534_vm6, %v530_v20, 1326507024  ;;  %v537_v38 = vsel %vm533_vm7, %v521_v15, %v536_v46  ;;  %v368_v27 = vor.u32 %v367_v29, %v366_v2 }
  0x7e   :  { %v1109_v48 = vadd.s32 4294967294, %v464_v58  ;;  %v542_v35 = vsel %vm532_vm8, %v539_v40, %v541_v57  ;;  %v545_v41 = vsel %vm533_vm7, %v527_v63, %v544_v53  ;;  %v372_v30 = vor.u32 4788187, %v371_v43 }
  0x7f   :  { %v452_v31 = vadd.s32 %v1446_v37, %v1451_v8  ;;  %v546_v5 = vsel %vm532_vm8, %v543_v44, %v545_v41  ;;  %v1506_v56 = vmul.u32.u64.low %v547_v52, %v542_v35  ;;  %v1507_v49 = vmul.u32.u64.high %v547_v52, %v542_v35, %v1506_v56 }
  0x80   :  { %vm1110_vm9 = vcmp.lt.s32.totalorder %v1109_v48, 0  ;;  %v538_v36 = vsel %vm532_vm8, %v535_v39, %v537_v38  ;;  %v1511_v25 = vmul.u32.u64.low %v547_v52, %v546_v5  ;;  %v1512_v26 = vmul.u32.u64.high %v547_v52, %v546_v5, %v1511_v25 }
  0x81   :  { %v467_v28 = vsel %vm1110_vm9, 0, %v1109_v48  ;;  %v270_v7 = vand.u32 2147483647, %v269_v23  ;;  %v272_v47 = vcvt.s32.f32 %v1485_v9  ;;  %v149_v10 = vmul.f32 0.6931472, %v1159_v16 }
  0x82   :  { %v472_v0 = vsub.s32 4294967266, %v467_v28  ;;  %v468_v3 = vsub.s32 32, %v467_v28  ;;  %v373_v12 = vand.u32 2147483647, %v372_v30  ;;  %v375_v37 = vcvt.s32.f32 %v368_v27 }
  0x83   :  { %v469_v8 = vshll.u32 %v1472_v45, %v467_v28  ;;  %v554_v14 = vmul.u32 %v547_v52, %v538_v36  ;;  %v557_v15 = vadd.s32 1, %v1507_v49  ;;  %v1518_v17 = vmul.f32 -2.0, %v1464_v62 }
  0x84   :  { %v473_v4 = vadd.s32 127, %v472_v0  ;;  %v470_v13 = vshrl.u32 %v452_v31, %v468_v3  ;;  %v273_v34 = vmul.f32 %v272_v47, %v270_v7  ;;  %vm556_vm10 = vc.u32 %v1512_v26, %v1506_v56 }
  0x85   :  { %v151_v54 = vmul.f32 0.6931472, %v1161_v18  ;;  %v1522_v63 = vmul.f32 -2.0, %v149_v10  ;;  %v558_v9 = vsel %vm556_vm10, %v557_v15, %v1507_v49  ;;  %v376_v16 = vmul.f32 %v375_v37, %v373_v12 }
  0x86   :  { %v474_v51 = vshll.u32 %v473_v4, 23  ;;  %v471_v58 = vor.u32 %v470_v13, %v469_v8  ;;  %v559_v19 = vadd.s32 %v558_v9, %v554_v14  ;;  %1164 = vrsqrt.f32 %v1518_v17 }
  0x87   :  { %v274_v20 = vxor.u32 2147483648, %v273_v34  ;;  %v153_v29 = vmul.f32 0.6931472, %v1163_v22  ;;  %v1526_v62 = vmul.f32 -2.0, %v151_v54  ;;  %1166 = vrsqrt.f32 %v1522_v63 }
  0x88   :  { %v475_v45 = vor.u32 4788187, %v474_v51  ;;  %v560_v2 = vadd.s32 536870912, %v559_v19  ;;  %vm192_vm11 = vcmp.lt.s32.totalorder %v1278_v60, 0  ;;  %v377_v18 = vxor.u32 2147483648, %v376_v16 }
  0x89   :  { %v478_v48 = vcvt.s32.f32 %v471_v58  ;;  %vm295_vm12 = vcmp.lt.s32.totalorder %v1280_v61, 0  ;;  %vm1535_vm13 = vcmp.le.f32.partialorder %v190_v21, 0.7853982  ;;  %v275_v22 = vsel %vm192_vm11, %v274_v20, %v273_v34 }
  0x8a   :  { %v476_v43 = vand.u32 2147483647, %v475_v45  ;;  %v1530_v46 = vshrl.u32 %v560_v2, 30  ;;  %v1542_v39 = vmul.f32 -2.0, %v153_v29  ;;  %vm1546_vm14 = vcmp.le.f32.partialorder %v293_v32, 0.7853982 }
  0x8b   :  { %1168 = vrsqrt.f32 %v1526_v62  ;;  %v378_v21 = vsel %vm295_vm12, %v377_v18, %v376_v16  ;;  %v276_v44 = vsub.s32 4, %v1360_v24  ;;  %v278_v53 = vsel %vm1535_vm13, %v1278_v60, %v275_v22 }
  0x8c   :  { %v562_v23 = vshll.u32 %v1530_v46, 30  ;;  %v479_v52 = vmul.f32 %v478_v48, %v476_v43  ;;  %1170 = vrsqrt.f32 %v1542_v39  ;;  %v379_v38 = vsub.s32 4, %v1407_v11 }
  0x8d   :  { %v381_v35 = vsel %vm1546_vm14, %v1280_v61, %v378_v21  ;;  %1172 = vcosq.f32 %v278_v53  ;;  %v277_v31 = vsel %vm192_vm11, %v276_v44, %v1360_v24  ;;  %vm398_vm15 = vcmp.lt.s32.totalorder %v1292_v33, 0 }
  0x8e   :  { %v1553_v57 = vsub.s32 %v559_v19, %v562_v23  ;;  %v480_v41 = vxor.u32 2147483648, %v479_v52  ;;  %1174 = vsinq.f32 %v278_v53  ;;  %vm160_vm0 = vcmp.eq.f32.partialorder %v1518_v17, inf }
  0x8f   :  { %1176 = vcosq.f32 %v381_v35  ;;  %v380_v5 = vsel %vm295_vm12, %v379_v38, %v1407_v11  ;;  %vm1577_vm1 = vcmp.le.f32.partialorder %v396_v50, 0.7853982  ;;  %vm162_vm2 = vcmp.eq.f32.partialorder %v1518_v17, 0.0 }
  0x90   :  { %v565_v28 = vsub.s32 0, %v1553_v57  ;;  %v1165_v32 = vpop.eup %1164  ;;  %1178 = vsinq.f32 %v381_v35  ;;  %v279_v24 = vsel %vm1535_vm13, 0, %v277_v31  ;;  %v481_v4 = vsel %vm398_vm15, %v480_v41, %v479_v52 }
  0x91   :  { %v1167_v30 = vpop.eup %1166  ;;  %v159_v0 = vmul.f32 %v1165_v32, %v1518_v17  ;;  %v163_v25 = vand.u32 2147483648, %v1518_v17  ;;  %vm167_vm3 = vcmp.eq.f32.partialorder %v1522_v63, inf  ;;  %v170_v50 = vand.u32 2147483648, %v1522_v63 }
  0x92   :  { %v1112_v27 = vmin.u32 %v565_v28, %v1553_v57  ;;  %v166_v11 = vmul.f32 %v1167_v30, %v1522_v63  ;;  %v382_v10 = vsel %vm1546_vm14, 0, %v380_v5  ;;  %v555_v12 = vadd.s32 %v1506_v56, %v1512_v26 }
  0x93   :  { %v161_v47 = vsel %vm160_vm0, %v1518_v17, %v159_v0  ;;  %v482_v37 = vsub.s32 4, %v1461_v55  ;;  %v484_v8 = vsel %vm1577_vm1, %v1292_v33, %v481_v4  ;;  %v699_v51 = vadd.s32 3, %v279_v24 }
  0x94   :  { %v567_v3 = vclz %v1112_v27  ;;  %v177_v14 = vand.u32 2147483648, %v1526_v62  ;;  %v1603_v16 = vsel %vm162_vm2, %v163_v25, %v161_v47  ;;  %v1608_v26 = vand.u32 3, %v279_v24 }
  0x95   :  { %v1169_v7 = vpop.eup %1168  ;;  %v1610_v58 = vand.u32 3, %v382_v10  ;;  %1180 = vcosq.f32 %v484_v8  ;;  %v803_v2 = vadd.s32 3, %v382_v10  ;;  %v168_v18 = vsel %vm167_vm3, %v1522_v63, %v166_v11 }
  0x96   :  { %v1113_v36 = vadd.s32 4294967294, %v567_v3  ;;  %v1171_v9 = vpop.eup %1170  ;;  %v1606_v56 = vmul.f32 %v1169_v7, %v1526_v62  ;;  %vm169_vm5 = vcmp.eq.f32.partialorder %v1522_v63, 0.0  ;;  %v483_v17 = vsel %vm398_vm15, %v482_v37, %v1461_v55 }
  0x97   :  { %v1173_v45 = vpop.eup %1172  ;;  %1182 = vsinq.f32 %v484_v8  ;;  %vm501_vm6 = vcmp.lt.s32.totalorder %v1399_v6, 0  ;;  %v700_v43 = vand.u32 3, %v699_v51  ;;  %v1621_v40 = vmul.f32 %v1171_v9, %v1542_v39 }
  0x98   :  { %vm1114_vm4 = vcmp.lt.s32.totalorder %v1113_v36, 0  ;;  %v1175_v29 = vpop.eup %1174  ;;  %vm1625_vm7 = vcmp.le.f32.partialorder %v499_v59, 0.7853982  ;;  %vm284_vm8 = vcmp.lt.s32.totalorder %v1608_v26, 2  ;;  %vm285_vm9 = vcmp.eq.s32.totalorder %v1608_v26, 0 }
  0x99   :  { %v570_v13 = vsel %vm1114_vm4, 0, %v1113_v36  ;;  %v1177_v48 = vpop.eup %1176  ;;  %vm288_vm10 = vcmp.eq.s32.totalorder %v1608_v26, 2  ;;  %vm387_vm11 = vcmp.lt.s32.totalorder %v1610_v58, 2  ;;  %v485_v55 = vsel %vm1577_vm1, 0, %v483_v17 }
  0x9a   :  { %v571_v15 = vsub.s32 32, %v570_v13  ;;  %v572_v34 = vshll.u32 %v1553_v57, %v570_v13  ;;  %v575_v54 = vsub.s32 4294967266, %v570_v13  ;;  %v1179_v21 = vpop.eup %1178  ;;  %v804_v59 = vand.u32 3, %v803_v2 }
  0x9b   :  { %v286_v44 = vxor.u32 2147483648, %v1175_v29  ;;  %v289_v53 = vxor.u32 2147483648, %v1173_v45  ;;  %vm702_vm14 = vcmp.eq.s32.totalorder %v700_v43, 0  ;;  %vm705_vm15 = vcmp.eq.s32.totalorder %v700_v43, 2 }
  0x9c   :  { %v573_v19 = vshrl.u32 %v555_v12, %v571_v15  ;;  %v576_v20 = vadd.s32 127, %v575_v54  ;;  %v389_v28 = vxor.u32 2147483648, %v1179_v21  ;;  %v392_v32 = vxor.u32 2147483648, %v1177_v48 }
  0x9d   :  { %v585_v35 = vsub.s32 4, %v1530_v46  ;;  %vm388_vm1 = vcmp.eq.s32.totalorder %v1610_v58, 0  ;;  %vm391_vm2 = vcmp.eq.s32.totalorder %v1610_v58, 2  ;;  %vm701_vm3 = vcmp.lt.s32.totalorder %v700_v43, 2 }
  0x9e   :  { %v574_v23 = vor.u32 %v573_v19, %v572_v34  ;;  %v577_v42 = vshll.u32 %v576_v20, 23  ;;  %v907_v41 = vadd.s32 3, %v485_v55  ;;  %v489_v27 = vand.u32 3, %v485_v55 }
  0x9f   :  { %vm806_vm4 = vcmp.eq.s32.totalorder %v804_v59, 0  ;;  %vm809_vm12 = vcmp.eq.s32.totalorder %v804_v59, 2  ;;  %v287_v31 = vsel %vm285_vm9, %v1173_v45, %v286_v44  ;;  %v290_v0 = vsel %vm288_vm10, %v289_v53, %v1175_v29  ;;  %v1181_v49 = vpop.eup %1180 }
  0xa0   :  { %v578_v52 = vor.u32 4788187, %v577_v42  ;;  %v581_v57 = vcvt.s32.f32 %v574_v23  ;;  %v704_v3 = vsel %vm702_vm14, %v1173_v45, %v286_v44  ;;  %v707_v5 = vsel %vm705_vm15, %v289_v53, %v1175_v29 }
  0xa1   :  { %v390_v24 = vsel %vm388_vm1, %v1177_v48, %v389_v28  ;;  %v393_v4 = vsel %vm391_vm2, %v392_v32, %v1179_v21  ;;  %v586_v25 = vsel %vm501_vm6, %v585_v35, %v1530_v46  ;;  %v1183_v11 = vpop.eup %1182  ;;  %vm176_vm0 = vcmp.eq.f32.partialorder %v1526_v62, 0.0 }
  0xa2   :  { %v579_v38 = vand.u32 2147483647, %v578_v52  ;;  %vm181_vm9 = vcmp.eq.f32.partialorder %v1542_v39, inf  ;;  %vm805_vm13 = vcmp.lt.s32.totalorder %v804_v59, 2  ;;  %v808_v7 = vsel %vm806_vm4, %v1177_v48, %v389_v28 }
  0xa3   :  { %v811_v47 = vsel %vm809_vm12, %v392_v32, %v1179_v21  ;;  %v908_v10 = vand.u32 3, %v907_v41  ;;  %v171_v12 = vsel %vm169_vm5, %v170_v50, %v168_v18  ;;  %v291_v37 = vsel %vm284_vm8, %v287_v31, %v290_v0 }
  0xa4   :  { %v582_v30 = vmul.f32 %v581_v57, %v579_v38  ;;  %vm491_vm10 = vcmp.eq.s32.totalorder %v489_v27, 0  ;;  %v394_v8 = vsel %vm387_vm11, %v390_v24, %v393_v4  ;;  %v588_v51 = vsel %vm1625_vm7, 0, %v586_v25 }
  0xa5   :  { %v708_v63 = vsel %vm701_vm3, %v704_v3, %v707_v5  ;;  %v492_v50 = vxor.u32 2147483648, %v1183_v11  ;;  %v495_v15 = vxor.u32 2147483648, %v1181_v49  ;;  %v812_v34 = vsel %vm805_vm13, %v808_v7, %v811_v47 }
  0xa6   :  { %v583_v36 = vxor.u32 2147483648, %v582_v30  ;;  %vm494_vm5 = vcmp.eq.s32.totalorder %v489_v27, 2  ;;  %vm910_vm8 = vcmp.eq.s32.totalorder %v908_v10, 0  ;;  %vm1729_vm12 = vweird.f32 %v1278_v60 }
  0xa7   :  { %v292_v54 = vsel %vm1729_vm12, nan, %v291_v37  ;;  %vm1730_vm11 = vweird.f32 %v1280_v61  ;;  %vm1731_vm14 = vmmov %vm1729_vm12  ;;  %v1011_v58 = vadd.s32 3, %v588_v51  ;;  %vm490_vm13 = vcmp.lt.s32.totalorder %v489_v27, 2 }
  0xa8   :  { %v584_v46 = vsel %vm501_vm6, %v583_v36, %v582_v30  ;;  %vm913_vm6 = vcmp.eq.s32.totalorder %v908_v10, 2  ;;  %v395_v9 = vsel %vm1730_vm11, nan, %v394_v8  ;;  %v709_v26 = vsel %vm1731_vm14, nan, %v708_v63  ;;  %vm1733_vm15 = vmmov %vm1730_vm11 }
  0xa9   :  { %v587_v13 = vsel %vm1625_vm7, %v1399_v6, %v584_v46  ;;  %vm1732_vm7 = vcmp.eq.f32.partialorder %v1526_v62, inf  ;;  %v813_v19 = vsel %vm1733_vm15, nan, %v812_v34  ;;  %vm909_vm1 = vcmp.lt.s32.totalorder %v908_v10, 2  ;;  %v1027_v34 = vld [vmem:[#allocation3 + $0x8] sm:$0xff] }
  0xaa   :  { %1184 = vcosq.f32 %v587_v13  ;;  %v175_v45 = vsel %vm1732_vm7, %v1526_v62, %v1606_v56  ;;  %v493_v20 = vsel %vm491_vm10, %v1181_v49, %v492_v50  ;;  %v496_v2 = vsel %vm494_vm5, %v495_v15, %v1183_v11 }
  0xab   :  { %1186 = vsinq.f32 %v587_v13  ;;  %v912_v29 = vsel %vm910_vm8, %v1181_v49, %v492_v50  ;;  %v915_v18 = vsel %vm913_vm6, %v495_v15, %v1183_v11  ;;  %v602_v17 = vmul.f32 %v292_v54, %v1603_v16  ;;  %v1026_v15 = vld [vmem:[#allocation3] sm:$0xff] }
  0xac   :  { %v603_v60 = vmul.f32 %v395_v9, %v171_v12  ;;  %v1022_v43 = vmul.f32 %v709_v26, %v1603_v16  ;;  %vm488_vm2 = vweird.f32 %v1292_v33  ;;  %v592_v48 = vand.u32 3, %v588_v51 }
  0xad   :  { %v1012_v22 = vand.u32 3, %v1011_v58  ;;  %vm183_vm3 = vcmp.eq.f32.partialorder %v1542_v39, 0.0  ;;  %v497_v56 = vsel %vm490_vm13, %v493_v20, %v496_v2  ;;  %v916_v61 = vsel %vm909_vm1, %v912_v29, %v915_v18 }
  0xae   :  { %v1023_v23 = vmul.f32 %v813_v19, %v171_v12  ;;  %v178_v42 = vsel %vm176_vm0, %v177_v14, %v175_v45  ;;  %v182_v21 = vsel %vm181_vm9, %v1542_v39, %v1621_v40  ;;  %v184_v16 = vand.u32 2147483648, %v1542_v39 }
  0xaf   :  { %v1243_v55 = vmov 1983009808   ;;  %vm591_vm4 = vweird.f32 %v1399_v6  ;;  %v1028_v57 = vmul.f32 0.05, %v602_v17  ;;  %v1029_v59 = vmul.f32 0.05, %v603_v60 }
  0xb0   :  { %v1047_v52 = vunpack.c.l.s4 %v1243_v55  ;;  %v1032_v44 = vmul.f32 0.05, %v1022_v43  ;;  %v498_v28 = vsel %vm488_vm2, nan, %v497_v56  ;;  %vm597_vm10 = vcmp.eq.s32.totalorder %v592_v48, 2 }
  0xb1   :  { %v917_v62 = vsel %vm488_vm2, nan, %v916_v61  ;;  %vm1017_vm0 = vcmp.eq.s32.totalorder %v1012_v22, 2  ;;  %vm594_vm9 = vcmp.eq.s32.totalorder %v592_v48, 0  ;;  %vm1014_vm5 = vcmp.eq.s32.totalorder %v1012_v22, 0 }
  0xb2   :  { %v1033_v32 = vmul.f32 0.05, %v1023_v23  ;;  %vm593_vm8 = vcmp.lt.s32.totalorder %v592_v48, 2  ;;  %vm1013_vm6 = vcmp.lt.s32.totalorder %v1012_v22, 2  ;;  %v1048_v35 = vunpack.c.0.s8 %v1047_v52 }
  0xb3   :  { %v604_v27 = vmul.f32 %v498_v28, %v178_v42  ;;  %v1024_v31 = vmul.f32 %v917_v62, %v178_v42  ;;  %v185_v0 = vsel %vm183_vm3, %v184_v16, %v182_v21  ;;  %v1044_v24 = vcombine.low %v1028_v57, %v1029_v59 }
  0xb4   :  { %v1185_v53 = vpop.eup %1184  ;;  %v1051_v25 = vsub.s32 %v1048_v35, %v1275_v1  ;;  %v1061_v11 = vcombine.low %v1032_v44, %v1033_v32 }
  0xb5   :  { %v1187_v14 = vpop.eup %1186  ;;  %v598_v40 = vxor.u32 2147483648, %v1185_v53  ;;  %v1030_v10 = vmul.f32 0.05, %v604_v27  ;;  %v1034_v12 = vmul.f32 0.05, %v1024_v31 }
  0xb6   :  { %v595_v38 = vxor.u32 2147483648, %v1187_v14  ;;  %v1052_v8 = vrot.slane %v1044_v24, %v1051_v25  ;;  %v1069_v51 = vrot.slane %v1061_v11, %v1051_v25 }
  0xb7   :  { %v599_v41 = vsel %vm597_vm10, %v598_v40, %v1187_v14  ;;  %v1019_v30 = vsel %vm1017_vm0, %v598_v40, %v1187_v14 }
  0xb8   :  { %v596_v3 = vsel %vm594_vm9, %v1185_v53, %v595_v38  ;;  %v1016_v33 = vsel %vm1014_vm5, %v1185_v53, %v595_v38 }
  0xb9   :  { %v600_v5 = vsel %vm593_vm8, %v596_v3, %v599_v41  ;;  %v1020_v49 = vsel %vm1013_vm6, %v1016_v33, %v1019_v30 }
  0xba   :  { %v601_v4 = vsel %vm591_vm4, nan, %v600_v5  ;;  %v1021_v36 = vsel %vm591_vm4, nan, %v1020_v49 }
  0xbb   :  { %v605_v7 = vmul.f32 %v601_v4, %v185_v0  ;;  %v1025_v47 = vmul.f32 %v1021_v36, %v185_v0 }
  0xbd   :  { %v1031_v39 = vmul.f32 0.05, %v605_v7  ;;  %v1035_v37 = vmul.f32 0.05, %v1025_v47 }
  0xbf   :  { %v1045_v46 = vcombine.low %v1030_v10, %v1031_v39  ;;  %v1062_v13 = vcombine.low %v1034_v12, %v1035_v37 }
  0xc1   :  { %v1059_v63 = vrot.slane %v1045_v46, %v1051_v25  ;;  %v1076_v50 = vrot.slane %v1062_v13, %v1051_v25 }
  0xc3   :  { %v1060_v6 = vcombine.low %v1052_v8, %v1059_v63  ;;  %v1077_v54 = vcombine.low %v1069_v51, %v1076_v50 }
  0xc5   :  { %v1080_v1 = vadd.f32 %v1060_v6, %v1026_v15  ;;  %v1081_v9 = vadd.f32 %v1077_v54, %v1027_v34 }
  0xc7   :  { %1082 = vst [vmem:[#allocation6] sm:$0xff] %v1080_v1  ;;  %1083 = vst [vmem:[#allocation6 + $0x8] sm:$0xff] %v1081_v9 }
  0xc8   :  { %1221 = shalt.err (!%p1218_p12)
}
  0xc9   :  { %s1222_s29 = scalar_lea.hbm %s1720_s2, 256 }
  0xca   :  { %p1223_p13 = scmp.ne.s32.totalorder %s1720_s2, %s1222_s29  ;;  %p1226_p0 = scmp.lt.u32.totalorder %s1222_s29, %s1720_s2 }
  0xcc   :  { %p1228_p1 = pnand %p1226_p0, %p1223_p13 }
  0xce   :  { %1231 = shalt.err (!%p1228_p1)
}
  0xcf   :  { %1093 = dma.vmem_to_hbm [thread:$0]  %s1091_s25, 256, %s1720_s2, [#allocation5]  }
  0xd0   :  { %1234 = dma.done.wait [#allocation5], 256  }
  0xd1   :  { %1235 = vsyncadd [#allocation5], 4294967040 }
  0xd2   :  { %1097 = vsyncpa [#allocation4], 1 }
  0xd3   :  { %1098 = vsyncpa [#allocation5], 1 }

</bundles_post_ra>
